<compile_context>
chip_gen: v5e
topology: v5e:2x2
jax: 0.10.0
libtpu: 0.0.40
codegen_flags: <defaults>
</compile_context>

<pallas_src>
import functools

import jax
import jax.numpy as jnp
from jax import lax
from jax.experimental import pallas as pl
from jax.experimental.pallas import tpu as pltpu

LANES = 128


def _round_up(a, m):
    return (a + m - 1) // m * m


def _row_granularity(dtype):
    size = jnp.dtype(dtype).itemsize
    if size >= 4:
        return 8
    if size == 2:
        return 16
    return 32


def _tpu_generation():
    """Best-effort chip detection -> (max_block_rows, num_tensorcores, is_v7)."""
    kind = ""
    try:
        kind = jax.devices()[0].device_kind.lower()
    except Exception:
        pass
    if "v7" in kind or "7x" in kind:
        return 8192, 2, True        # 3.2 TB/s HBM, 2 TCs/chip
    if "v6" in kind:
        return 4096, 1, False       # v6e: single TC
    if "v5p" in kind or "v4" in kind:
        return 4096, 2, False       # megacore: 2 TCs, plain "parallel" shards the grid
    return 2048, 1, False           # v5e / unknown: stay well under 16 MiB scoped VMEM


def _canon_logits(a):
    if a.dtype in (jnp.float32, jnp.bfloat16, jnp.float16):
        return a
    return a.astype(jnp.float32)


def _canon_target(a):
    if a.dtype in (jnp.float32, jnp.bfloat16, jnp.float16, jnp.int8, jnp.uint8):
        return a
    if a.dtype == jnp.bool_:
        return a.astype(jnp.uint8)
    return a.astype(jnp.float32)


def _focal_kernel(x_ref, t_ref, o_ref, acc_ref, *,
                  gamma, on_value, off_value,
                  block_rows, blocks_per_split,
                  num_blocks, valid_in_last, has_phantom):
    c = pl.program_id(0)          # split index (core-parallel on v7x)
    i = pl.program_id(1)          # block index within this split

    @pl.when(i == 0)
    def _():
        acc_ref[...] = jnp.zeros_like(acc_ref)

    # cast (possibly narrow) inputs to f32 inside the kernel, under the DMA
    x = x_ref[...].astype(jnp.float32)
    t = t_ref[...].astype(jnp.float32)

    # label smoothing: target = where(target > 0.5, on_value, off_value)
    t = jnp.where(t > 0.5, jnp.float32(on_value), jnp.float32(off_value))

    # numerically stable BCE-with-logits, reduction='none':
    #   bce = max(x, 0) - x*t + log(1 + exp(-|x|))
    bce = jnp.maximum(x, 0.0) - x * t + jnp.log(1.0 + jnp.exp(-jnp.abs(x)))

    pt = jnp.exp(-bce)
    one_m_pt = 1.0 - pt

    # focal term; specialize integer gamma (default 2) to repeated multiplies.
    # NOTE: alpha is applied to the reduced scalar in the wrapper (sum is linear).
    ig = int(gamma)
    if float(gamma) == float(ig) and 0 <= ig <= 8:
        if ig == 0:
            focal = bce
        else:
            pow_term = one_m_pt
            for _ in range(ig - 1):
                pow_term = pow_term * one_m_pt
            focal = pow_term * bce
    else:
        focal = jnp.power(one_m_pt, jnp.float32(gamma)) * bce

    def _fold(v):
        # VALU-only fold of (block_rows, 128) into the (8, 128) accumulator
        return jnp.sum(v.reshape(block_rows // 8, 8, LANES), axis=0)

    block_elems = block_rows * LANES
    needs_tail_mask = valid_in_last < block_elems      # static Python bool
    g = c * blocks_per_split + i                       # global block id (small int32)

    if needs_tail_mask:
        @pl.when(g < num_blocks - 1)
        def _():
            acc_ref[...] += _fold(focal)

        @pl.when(g == num_blocks - 1)
        def _():
            # block-local mask: covers host zero-pad and Pallas partial-block garbage
            row_ids = lax.broadcasted_iota(jnp.int32, focal.shape, 0)
            col_ids = lax.broadcasted_iota(jnp.int32, focal.shape, 1)
            in_block_idx = row_ids * LANES + col_ids
            masked = jnp.where(in_block_idx < valid_in_last, focal, 0.0)
            acc_ref[...] += _fold(masked)
    elif has_phantom:
        @pl.when(g < num_blocks)
        def _():
            acc_ref[...] += _fold(focal)
    else:
        acc_ref[...] += _fold(focal)

    # each split writes its (8,128) partial sum once, at its last block
    @pl.when(i == pl.num_programs(1) - 1)
    def _():
        o_ref[0] = acc_ref[...]


def bce_focal_loss2(inp, target, alpha=0.25, gamma=2.0, smoothing=0.01):
    """Pallas TPU implementation of BCEFocalLoss2.forward (mean-reduced scalar)."""
    assert inp.shape[0] == target.shape[0]

    x = _canon_logits(jnp.ravel(inp))
    t = _canon_target(jnp.ravel(target))

    n = x.shape[0]
    if n == 0:
        # torch: mean() over an empty tensor is nan
        return jnp.float32(jnp.nan)

    cap_rows, num_tc, is_v7 = _tpu_generation()
    gran = max(_row_granularity(x.dtype), _row_granularity(t.dtype))

    rows_needed = pl.cdiv(n, LANES)
    if rows_needed <= cap_rows:
        rows = _round_up(rows_needed, gran)   # single block, aligned to dtype tiling
        block_rows = rows
    else:
        rows = rows_needed                    # ragged grid; last block is partial
        block_rows = cap_rows                 # caps are multiples of 32

    n_padded = rows * LANES
    if n_padded != n:
        # tiny tail pad only (< gran*128 elements); aligned inputs skip this entirely
        x = jnp.pad(x, (0, n_padded - n))
        t = jnp.pad(t, (0, n_padded - n))
    x2 = x.reshape(rows, LANES)
    t2 = t.reshape(rows, LANES)

    num_blocks = pl.cdiv(rows, block_rows)
    nsplit = num_tc if (num_tc > 1 and num_blocks >= num_tc) else 1
    blocks_per_split = pl.cdiv(num_blocks, nsplit)
    has_phantom = nsplit * blocks_per_split > num_blocks

    # all static Python ints -> no runtime flat-index math, no int32 overflow risk
    valid_in_last = n - (num_blocks - 1) * block_rows * LANES

    kernel = functools.partial(
        _focal_kernel,
        gamma=float(gamma),
        on_value=1.0 - float(smoothing),
        off_value=float(smoothing),
        block_rows=block_rows,
        blocks_per_split=blocks_per_split,
        num_blocks=num_blocks,
        valid_in_last=valid_in_last,
        has_phantom=has_phantom,
    )

    if has_phantom:
        def in_idx(c, i):
            # clamp phantom blocks of the last split back in-bounds (kernel skips them)
            return (jnp.minimum(c * blocks_per_split + i, num_blocks - 1), 0)
    else:
        def in_idx(c, i):
            return (c * blocks_per_split + i, 0)

    if nsplit > 1:
        lead_sem = getattr(pltpu, "CORE_PARALLEL", pltpu.PARALLEL) if is_v7 else pltpu.PARALLEL
    else:
        lead_sem = pltpu.ARBITRARY

    per_step_bytes = block_rows * LANES * (x2.dtype.itemsize + t2.dtype.itemsize)
    vmem_limit = int(min(max(2 * per_step_bytes + (4 << 20), 16 << 20), 32 << 20))

    partials = pl.pallas_call(
        kernel,
        out_shape=jax.ShapeDtypeStruct((nsplit, 8, LANES), jnp.float32),
        grid=(nsplit, blocks_per_split),
        in_specs=[
            pl.BlockSpec((block_rows, LANES), in_idx),
            pl.BlockSpec((block_rows, LANES), in_idx),
        ],
        out_specs=pl.BlockSpec((1, 8, LANES), lambda c, i: (c, 0, 0)),
        scratch_shapes=[pltpu.VMEM((8, LANES), jnp.float32)],
        compiler_params=pltpu.CompilerParams(
            dimension_semantics=(lead_sem, pltpu.ARBITRARY),
            vmem_limit_bytes=vmem_limit),
    )(x2, t2)

    # alpha hoisted out of the kernel; final cross-lane reduction + mean here
    return jnp.float32(alpha) * (jnp.sum(partials) / jnp.float32(n))


def _reference(inp, target, alpha=0.25, gamma=2.0, smoothing=0.01):
    x = jnp.ravel(inp).astype(jnp.float32)
    t = jnp.ravel(target).astype(jnp.float32)
    t = jnp.where(t > 0.5, 1.0 - smoothing, smoothing)
    bce = jnp.maximum(x, 0.0) - x * t + jnp.log1p(jnp.exp(-jnp.abs(x)))
    pt = jnp.exp(-bce)
    return jnp.mean(alpha * (1.0 - pt) ** gamma * bce)


if __name__ == "__main__":
    key = jax.random.PRNGKey(0)
    k1, k2, k3, k4, k5, k6 = jax.random.split(key, 6)

    # small NCHW-like case: single block, 128-aligned (free reshape, no pad, no mask)
    x1 = jax.random.normal(k1, (2, 4, 16, 16), dtype=jnp.float32)
    t1 = (jax.random.uniform(k2, (2, 4, 16, 16)) > 0.5).astype(jnp.float32)
    loss1 = jax.block_until_ready(bce_focal_loss2(x1, t1))
    ref1 = _reference(x1, t1)
    assert jnp.allclose(loss1, ref1, rtol=1e-4, atol=1e-6), (loss1, ref1)

    # ragged case: n % 128 != 0 -> minimal tail pad + in-kernel block-local mask
    x2 = jax.random.normal(k3, (3, 5, 37, 41), dtype=jnp.float32)
    t2 = (jax.random.uniform(k4, (3, 5, 37, 41)) > 0.5).astype(jnp.float32)
    loss2 = jax.block_until_ready(bce_focal_loss2(x2, t2))
    ref2 = _reference(x2, t2)
    assert jnp.allclose(loss2, ref2, rtol=1e-4, atol=1e-6), (loss2, ref2)

    # larger case: exercises the multi-block ragged grid / partial last block on
    # chips whose block cap is below 2304 rows (e.g. v5e), single block elsewhere
    x3 = jax.random.normal(k5, (4, 8, 96, 96), dtype=jnp.float32)
    t3 = (jax.random.uniform(k6, (4, 8, 96, 96)) > 0.5).astype(jnp.float32)
    loss3 = jax.block_until_ready(bce_focal_loss2(x3, t3))
    ref3 = _reference(x3, t3)
    assert jnp.allclose(loss3, ref3, rtol=1e-4, atol=1e-6), (loss3, ref3)

    print("KERNEL_OK")
</pallas_src>

<mosaic_0001>
module attributes {stable_mosaic.version = 11 : i64} {
  func.func @_focal_kernel(%arg0: i32, %arg1: i32, %arg2: memref<16x128xf32, #tpu.memory_space<vmem>>, %arg3: memref<16x128xf32, #tpu.memory_space<vmem>>, %arg4: memref<1x8x128xf32, #tpu.memory_space<vmem>>, %arg5: memref<8x128xf32, #tpu.memory_space<vmem>>) attributes {dimension_semantics = [#tpu.dimension_semantics<arbitrary>, #tpu.dimension_semantics<arbitrary>], iteration_bounds = array<i64: 1, 1>, scalar_prefetch = 0 : i64, scratch_operands = 1 : i64, tpu.core_type = #tpu.core_type<tc>, window_params = [{transform_indices = @transform_0, window_bounds = array<i64: 16, 128>}, {transform_indices = @transform_1, window_bounds = array<i64: 16, 128>}, {transform_indices = @transform_2, window_bounds = array<i64: 1, 8, 128>}]} {
    %c0_i32 = arith.constant 0 : i32
    %0 = arith.cmpi eq, %arg1, %c0_i32 : i32
    %1 = arith.extui %0 : i1 to i32
    %c0_i32_0 = arith.constant 0 : i32
    %2 = arith.cmpi ne, %1, %c0_i32_0 : i32
    scf.if %2 {
      %cst_18 = arith.constant 0.000000e+00 : f32
      %37 = vector.broadcast %cst_18 : f32 to vector<8x128xf32>
      %c0_19 = arith.constant 0 : index
      %c0_20 = arith.constant 0 : index
      %38 = vector.load %arg5[%c0_19, %c0_20] : memref<8x128xf32, #tpu.memory_space<vmem>>, vector<8x128xf32>
      tpu.vector_store %arg5[%c0_19, %c0_20], %37 {strides = array<i32>} : memref<8x128xf32, #tpu.memory_space<vmem>>, vector<8x128xf32>,
    } else {
    }
    %c0 = arith.constant 0 : index
    %c0_1 = arith.constant 0 : index
    %3 = vector.load %arg2[%c0, %c0_1] : memref<16x128xf32, #tpu.memory_space<vmem>>, vector<16x128xf32>
    %c0_2 = arith.constant 0 : index
    %c0_3 = arith.constant 0 : index
    %4 = vector.load %arg3[%c0_2, %c0_3] : memref<16x128xf32, #tpu.memory_space<vmem>>, vector<16x128xf32>
    %cst = arith.constant 5.000000e-01 : f32
    %5 = vector.broadcast %cst : f32 to vector<16x128xf32>
    %6 = arith.cmpf ogt, %4, %5 : vector<16x128xf32>
    %cst_4 = arith.constant 9.900000e-01 : f32
    %cst_5 = arith.constant 0.00999999977 : f32
    %7 = vector.broadcast %cst_4 : f32 to vector<16x128xf32>
    %8 = vector.broadcast %cst_5 : f32 to vector<16x128xf32>
    %9 = arith.select %6, %7, %8 : vector<16x128xi1>, vector<16x128xf32>
    %cst_6 = arith.constant 0.000000e+00 : f32
    %10 = vector.broadcast %cst_6 : f32 to vector<16x128xf32>
    %11 = arith.maximumf %3, %10 : vector<16x128xf32>
    %12 = arith.mulf %3, %9 : vector<16x128xf32>
    %13 = arith.subf %11, %12 : vector<16x128xf32>
    %14 = math.absf %3 : vector<16x128xf32>
    %cst_7 = arith.constant 0.000000e+00 : f32
    %15 = vector.broadcast %cst_7 : f32 to vector<16x128xf32>
    %16 = arith.subf %15, %14 : vector<16x128xf32>
    %17 = math.exp %16 : vector<16x128xf32>
    %cst_8 = arith.constant 1.000000e+00 : f32
    %18 = vector.broadcast %cst_8 : f32 to vector<16x128xf32>
    %19 = arith.addf %18, %17 : vector<16x128xf32>
    %20 = math.log %19 : vector<16x128xf32>
    %21 = arith.addf %13, %20 : vector<16x128xf32>
    %cst_9 = arith.constant 0.000000e+00 : f32
    %22 = vector.broadcast %cst_9 : f32 to vector<16x128xf32>
    %23 = arith.subf %22, %21 : vector<16x128xf32>
    %24 = math.exp %23 : vector<16x128xf32>
    %cst_10 = arith.constant 1.000000e+00 : f32
    %25 = vector.broadcast %cst_10 : f32 to vector<16x128xf32>
    %26 = arith.subf %25, %24 : vector<16x128xf32>
    %27 = arith.mulf %26, %26 : vector<16x128xf32>
    %28 = arith.mulf %27, %21 : vector<16x128xf32>
    %c0_11 = arith.constant 0 : index
    %c0_12 = arith.constant 0 : index
    %29 = vector.load %arg5[%c0_11, %c0_12] : memref<8x128xf32, #tpu.memory_space<vmem>>, vector<8x128xf32>
    %30 = vector.shape_cast %28 : vector<16x128xf32> to vector<2x8x128xf32>
    %cst_13 = arith.constant dense<0.000000e+00> : vector<8x128xf32>
    %31 = vector.multi_reduction <add>, %30, %cst_13 [0] : vector<2x8x128xf32> to vector<8x128xf32>
    %32 = arith.addf %29, %31 : vector<8x128xf32>
    %c0_14 = arith.constant 0 : index
    %c0_15 = arith.constant 0 : index
    %33 = vector.load %arg5[%c0_14, %c0_15] : memref<8x128xf32, #tpu.memory_space<vmem>>, vector<8x128xf32>
    tpu.vector_store %arg5[%c0_14, %c0_15], %32 {strides = array<i32>} : memref<8x128xf32, #tpu.memory_space<vmem>>, vector<8x128xf32>,
    %c0_i32_16 = arith.constant 0 : i32
    %34 = arith.cmpi eq, %arg1, %c0_i32_16 : i32
    %35 = arith.extui %34 : i1 to i32
    %c0_i32_17 = arith.constant 0 : i32
    %36 = arith.cmpi ne, %35, %c0_i32_17 : i32
    scf.if %36 {
      %c0_18 = arith.constant 0 : index
      %c0_19 = arith.constant 0 : index
      %37 = vector.load %arg5[%c0_18, %c0_19] : memref<8x128xf32, #tpu.memory_space<vmem>>, vector<8x128xf32>
      %c0_20 = arith.constant 0 : index
      %c0_21 = arith.constant 0 : index
      %c0_22 = arith.constant 0 : index
      %38 = vector.load %arg4[%c0_20, %c0_21, %c0_22] : memref<1x8x128xf32, #tpu.memory_space<vmem>>, vector<1x8x128xf32>
      %39 = vector.shape_cast %38 : vector<1x8x128xf32> to vector<8x128xf32>
      %40 = vector.shape_cast %37 : vector<8x128xf32> to vector<1x8x128xf32>
      tpu.vector_store %arg4[%c0_20, %c0_21, %c0_22], %40 {strides = array<i32>} : memref<1x8x128xf32, #tpu.memory_space<vmem>>, vector<1x8x128xf32>,
    } else {
    }
    return
  }
  func.func @transform_0(%arg0: i32, %arg1: i32) -> (i32, i32) {
    %c1_i32 = arith.constant 1 : i32
    %0 = arith.muli %arg0, %c1_i32 : i32
    %1 = arith.addi %0, %arg1 : i32
    %c0_i32 = arith.constant 0 : i32
    %c0_i32_0 = arith.constant 0 : i32
    return %1, %c0_i32 : i32, i32
  }
  func.func @transform_1(%arg0: i32, %arg1: i32) -> (i32, i32) {
    %c1_i32 = arith.constant 1 : i32
    %0 = arith.muli %arg0, %c1_i32 : i32
    %1 = arith.addi %0, %arg1 : i32
    %c0_i32 = arith.constant 0 : i32
    %c0_i32_0 = arith.constant 0 : i32
    return %1, %c0_i32 : i32, i32
  }
  func.func @transform_2(%arg0: i32, %arg1: i32) -> (i32, i32, i32) {
    %c0_i32 = arith.constant 0 : i32
    %c0_i32_0 = arith.constant 0 : i32
    %c0_i32_1 = arith.constant 0 : i32
    return %arg0, %c0_i32, %c0_i32_0 : i32, i32, i32
  }
}

</mosaic_0001>

<bundles_post_ra>
// kernel: tpu_custom_call.1
= control target key start
LH: loop header
LB: loop body
LE: loop exit
PB: predicated region body
PF: predicated region fallthrough
CT: control target
= control target key end

     0   :  { %7 = vsyncpa [#allocation4], 0  ;;  %s256_s0 = inlined_call_operand.hbm [shape: f32[16,128], index: 0, kind: input, shape index: {}]   ;;  %s257_s1 = inlined_call_operand.hbm [shape: f32[16,128], index: 1, kind: input, shape index: {}]   ;;  %s258_s2 = inlined_call_operand.hbm [shape: f32[1,8,128], index: 2, kind: output, shape index: {}]  }
   0x1   :  { %8 = vsyncpa [#allocation7], 0 }
   0x2   :  { %9 = vsyncpa [#allocation5], 0  ;;  %s18_s11 = sshll.u32 %s256_s0, 4  ;;  %s226_s12 = smov [#allocation3]   ;;  %s19_s11 = int_to_ptr.hbm [resolvable:$true] %s18_s11 }
   0x3   :  { %s20_s13 = sshll.u32 %s226_s12, 4  ;;  %s35_s16 = sshll.u32 %s257_s1, 4  ;;  %s21_s13 = int_to_ptr.vmem [resolvable:$true] %s20_s13  ;;  %s36_s16 = int_to_ptr.hbm [resolvable:$true] %s35_s16 }
   0x4   :  { %s227_s17 = smov 128   ;;  %s228_s18 = smov 8  }
   0x5   :  { %26 = dma.hbm_to_vmem [thread:$0]  %s19_s11, 256, %s21_s13, [#allocation4], %s227_s17, %s227_s17, %s228_s18  }
   0x6   :  { %s229_s19 = smov [#allocation6]  }
   0x7   :  { %s37_s20 = sshll.u32 %s229_s19, 4  ;;  %s38_s20 = int_to_ptr.vmem [resolvable:$true] %s37_s20 }
   0x8   :  { %43 = dma.hbm_to_vmem [thread:$0]  %s36_s16, 256, %s38_s20, [#allocation7], %s227_s17, %s227_s17, %s228_s18  }
   0x9   :  { %220 = dma.done.wait [#allocation4], 256  }
   0xa   :  { %221 = vsyncadd [#allocation4], 4294967040 }
   0xb   :  { %222 = dma.done.wait [#allocation7], 256  }
   0xc   :  { %223 = vsyncadd [#allocation7], 4294967040  ;;  %v61_v0 = vld [vmem:[#allocation3] sm:$0xff]  ;;  %v62_v1 = vld [vmem:[#allocation3 + $0x8] sm:$0xff]  ;;  %v230_v12 = vmov 0.01  }
   0xd   :  { %v75_v2 = vand.u32 2147483647, %v61_v0  ;;  %v76_v3 = vand.u32 2147483647, %v62_v1  ;;  %v63_v8 = vld [vmem:[#allocation6] sm:$0xff]  ;;  %v64_v9 = vld [vmem:[#allocation6 + $0x8] sm:$0xff] }
   0xe   :  { %vm65_vm0 = vcmp.gt.f32.partialorder %v63_v8, 0.5  ;;  %vm66_vm1 = vcmp.gt.f32.partialorder %v64_v9, 0.5  ;;  %v69_v17 = vmax.f32 %v61_v0, 0.0  ;;  %v70_v19 = vmax.f32 %v62_v1, 0.0  ;;  %s231_s0 = smov [#allocation8]   ;;  %s119_s23 = sshll.u32 %s258_s2, 4  ;;  %s120_s23 = int_to_ptr.hbm [resolvable:$true] %s119_s23 }
   0xf   :  { %v77_v4 = vsub.f32 0.0, %v75_v2  ;;  %v78_v5 = vsub.f32 0.0, %v76_v3  ;;  %v67_v13 = vsel %vm65_vm0, 0.99, %v230_v12  ;;  %v68_v15 = vsel %vm66_vm1, 0.99, %v230_v12 }
  0x10   :  { %v71_v18 = vmul.f32 %v67_v13, %v61_v0  ;;  %v72_v20 = vmul.f32 %v68_v15, %v62_v1  ;;  %s117_s1 = sshll.u32 %s231_s0, 4  ;;  %s118_s1 = int_to_ptr.vmem [resolvable:$true] %s117_s1 }
  0x11   :  { %v79_v6 = vmul.f32 1.442695, %v77_v4  ;;  %v81_v7 = vmul.f32 1.442695, %v78_v5 }
  0x12   :  { %v73_v21 = vsub.f32 %v69_v17, %v71_v18  ;;  %v74_v23 = vsub.f32 %v70_v19, %v72_v20 }
  0x13   :  { %136 = vpow2.f32 %v79_v6 }
  0x14   :  { %138 = vpow2.f32 %v81_v7 }
  0x19   :  { %v137_v10 = vpop.eup %136 }
  0x1a   :  { %v139_v11 = vpop.eup %138  ;;  %v83_v14 = vadd.f32 1.0, %v137_v10 }
  0x1b   :  { %v84_v16 = vadd.f32 1.0, %v139_v11 }
  0x1c   :  { %140 = vlog2.f32 %v83_v14 }
  0x1d   :  { %142 = vlog2.f32 %v84_v16 }
  0x22   :  { %v141_v22 = vpop.eup %140 }
  0x23   :  { %v143_v24 = vpop.eup %142  ;;  %v86_v25 = vmul.f32 0.6931472, %v141_v22 }
  0x24   :  { %v88_v26 = vmul.f32 0.6931472, %v143_v24 }
  0x25   :  { %v89_v27 = vadd.f32 %v86_v25, %v73_v21 }
  0x26   :  { %v90_v28 = vadd.f32 %v88_v26, %v74_v23 }
  0x27   :  { %v91_v29 = vsub.f32 0.0, %v89_v27 }
  0x28   :  { %v92_v30 = vsub.f32 0.0, %v90_v28 }
  0x29   :  { %v93_v31 = vmul.f32 1.442695, %v91_v29 }
  0x2a   :  { %v95_v32 = vmul.f32 1.442695, %v92_v30 }
  0x2b   :  { %144 = vpow2.f32 %v93_v31 }
  0x2c   :  { %146 = vpow2.f32 %v95_v32 }
  0x31   :  { %v145_v33 = vpop.eup %144 }
  0x32   :  { %v147_v34 = vpop.eup %146  ;;  %v97_v35 = vsub.f32 1.0, %v145_v33 }
  0x33   :  { %v98_v36 = vsub.f32 1.0, %v147_v34 }
  0x34   :  { %v99_v37 = vmul.f32 %v97_v35, %v97_v35 }
  0x35   :  { %v100_v38 = vmul.f32 %v98_v36, %v98_v36 }
  0x36   :  { %v101_v39 = vmul.f32 %v99_v37, %v89_v27 }
  0x37   :  { %v102_v40 = vmul.f32 %v100_v38, %v90_v28 }
  0x39   :  { %v104_v41 = vadd.f32 %v102_v40, %v101_v39 }
  0x3b   :  { %111 = vst [vmem:[#allocation8] sm:$0xff] %v104_v41 }
  0x3c   :  { %122 = dma.vmem_to_hbm [thread:$0]  %s118_s1, 128, %s120_s23, [#allocation5]  }
  0x3d   :  { %224 = dma.done.wait [#allocation5], 128  }
  0x3e   :  { %225 = vsyncadd [#allocation5], 4294967168 }
  0x3f   :  { %127 = vsyncpa [#allocation4], 1 }
  0x40   :  { %128 = vsyncpa [#allocation7], 1 }
  0x41   :  { %129 = vsyncpa [#allocation5], 1 }

</bundles_post_ra>
